<compile_context>
chip_gen: v6e
topology: v6e:2x2x1
jax: 0.10.0
libtpu: 0.0.40
codegen_flags: <defaults>
</compile_context>

<pallas_src>
import jax
import jax.numpy as jnp
from jax import lax
from jax.experimental import pallas as pl
from jax.experimental.pallas import tpu as pltpu


def _round_up(x: int, m: int) -> int:
    return ((x + m - 1) // m) * m


def _masked_embedding_gather_kernel(ids_ref, table_hbm, out_ref, buf, sem):
    # ids_ref:   (N_pad,)   int32 token ids, SMEM (scalar-prefetched).
    # table_hbm: (V+1, H)   embedding table, left in HBM (pl.ANY).
    # out_ref:   (TM, H)    output tile in VMEM (auto-pipelined writeback).
    # buf:       (2, TM, H) VMEM gather scratch, double-buffered across tiles.
    # sem:       (2,)       DMA semaphores, one per scratch slot.
    tm = out_ref.shape[0]
    i = pl.program_id(0)
    nt = pl.num_programs(0)

    def issue_tile(tile, slot):
        # Issue TM row DMAs (H*esize bytes each) for token tile `tile` into `slot`.
        def body(r, carry):
            tok = ids_ref[tile * tm + r]          # must be in [0, vocab_size]
            pltpu.make_async_copy(
                table_hbm.at[tok], buf.at[slot, r], sem.at[slot]
            ).start()
            return carry

        lax.fori_loop(0, tm, body, 0)

    # Prime the pipeline on the first tile.
    @pl.when(i == 0)
    def _():
        issue_tile(0, 0)

    # Prefetch the next tile's rows into the other slot while this tile's DMAs land.
    @pl.when(i + 1 < nt)
    def _():
        issue_tile(i + 1, (i + 1) % 2)

    # Wait for the current tile's row DMAs (issued at the previous grid step, or by the
    # priming branch for tile 0), then emit one lane/sublane-dense store to out_ref.
    slot = i % 2

    def wait_body(r, carry):
        tok = ids_ref[i * tm + r]
        pltpu.make_async_copy(
            table_hbm.at[tok], buf.at[slot, r], sem.at[slot]
        ).wait()
        return carry

    lax.fori_loop(0, tm, wait_body, 0)

    out_ref[...] = buf[slot]


def masked_embedding(input_seq, emb_table, mask_idx: int, *, tm: int = 512):
    """Equivalent of MaskedEmbedding.forward: returns (embedded (B,T,H), mask (B,T) bool)."""
    B, T = input_seq.shape
    _, H = emb_table.shape
    N = B * T

    # Mask is a trivial VPU compare over B*T ints -> plain JAX.
    mask = input_seq != mask_idx

    esize = emb_table.dtype.itemsize

    # Per-generation VMEM cap (v7x: 64 MiB per TC; v5e/v6e: 128 MiB). Keep headroom.
    try:
        vmem_cap = int(pltpu.get_tpu_info().vmem_capacity_bytes)
    except Exception:  # fall back to the smallest generation (v7x)
        vmem_cap = 64 << 20
    vmem_budget = (vmem_cap * 3) // 4

    # VMEM bytes per token row: 2-slot gather scratch + double-buffered output block.
    per_row = 4 * H * esize
    cap = max(8, min(int(tm), vmem_budget // max(per_row, 1)))
    cap = max(8, (cap // 8) * 8)

    # Pick TM dividing N (and a multiple of 8) when possible -> no ids padding and no
    # output prefix-slice copy. Fall back to padding with mask_idx (the zero row).
    TM = None
    if N % 8 == 0:
        for cand in range(min(cap, N), 7, -8):
            if N % cand == 0:
                TM = cand
                break
    if TM is None:
        TM = min(cap, _round_up(N, 8))
    num_tiles = pl.cdiv(N, TM)
    N_pad = num_tiles * TM
    needs_pad = N_pad != N

    ids = input_seq.reshape(N).astype(jnp.int32)
    if needs_pad:
        # Padded positions gather the zero padding row; they are sliced off below.
        ids = jnp.pad(ids, (0, N_pad - N), constant_values=mask_idx)

    vmem_bytes = 4 * TM * H * esize + (2 << 20)
    vmem_limit = min(max(vmem_bytes, 16 << 20), vmem_budget)

    grid_spec = pltpu.PrefetchScalarGridSpec(
        num_scalar_prefetch=1,
        grid=(num_tiles,),
        in_specs=[pl.BlockSpec(memory_space=pl.ANY)],          # table stays in HBM
        out_specs=pl.BlockSpec((TM, H), lambda i, ids_ref: (i, 0)),
        scratch_shapes=[
            pltpu.VMEM((2, TM, H), emb_table.dtype),           # gather double-buffer
            pltpu.SemaphoreType.DMA((2,)),
        ],
    )

    embedded_flat = pl.pallas_call(
        _masked_embedding_gather_kernel,
        grid_spec=grid_spec,
        out_shape=jax.ShapeDtypeStruct((N_pad, H), emb_table.dtype),
        compiler_params=pltpu.CompilerParams(
            # "arbitrary": the cross-tile DMA prefetch is primed at tile 0 and needs
            # sequential grid execution; the kernel is HBM-bound, so megacore sharding
            # would not add bandwidth on v7x.
            dimension_semantics=("arbitrary",),
            vmem_limit_bytes=vmem_limit,
        ),
    )(ids, emb_table)

    if needs_pad:
        embedded_flat = embedded_flat[:N]
    embedded = embedded_flat.reshape(B, T, H)
    return embedded, mask


if __name__ == "__main__":
    key = jax.random.PRNGKey(0)
    B, T, H, vocab_size = 2, 8, 128, 64
    mask_idx = vocab_size  # == gpt3conf.vocab_size

    k_emb, k_ids = jax.random.split(key)
    # nn.Embedding(vocab_size + 1, H, padding_idx=vocab_size): N(0,1) init, padding row zeroed.
    emb_table = jax.random.normal(k_emb, (vocab_size + 1, H), dtype=jnp.float32)
    emb_table = emb_table.at[mask_idx].set(0.0)

    input_seq = jax.random.randint(k_ids, (B, T), 0, vocab_size + 1, dtype=jnp.int32)
    input_seq = input_seq.at[0, 0].set(mask_idx)  # ensure at least one masked position

    embedded, mask = masked_embedding(input_seq, emb_table, mask_idx)
    jax.block_until_ready((embedded, mask))

    # Reference check (plain JAX).
    ref_embedded = jnp.take(emb_table, input_seq, axis=0)
    ref_mask = input_seq != mask_idx
    assert embedded.shape == (B, T, H) and embedded.dtype == jnp.float32
    assert mask.shape == (B, T) and mask.dtype == jnp.bool_
    assert jnp.allclose(embedded, ref_embedded, atol=1e-6)
    assert jnp.array_equal(mask, ref_mask)

    print("KERNEL_OK")
</pallas_src>

<mosaic_0001>
module attributes {stable_mosaic.version = 11 : i64} {
  func.func @_masked_embedding_gather_kernel(%arg0: i32, %arg1: memref<16xi32, #tpu.memory_space<smem>>, %arg2: memref<65x128xf32, #tpu.memory_space<any>>, %arg3: memref<16x128xf32, #tpu.memory_space<vmem>>, %arg4: memref<2x16x128xf32, #tpu.memory_space<vmem>>, %arg5: memref<2x!tpu.dma_semaphore, #tpu.memory_space<semaphore_mem>>) attributes {dimension_semantics = [#tpu.dimension_semantics<arbitrary>], iteration_bounds = array<i64: 1>, scalar_prefetch = 1 : i64, scratch_operands = 2 : i64, tpu.core_type = #tpu.core_type<tc>, window_params = [{}, {transform_indices = @transform_1, window_bounds = array<i64: 16, 128>}]} {
    %c0_i32 = arith.constant 0 : i32
    %0 = arith.cmpi eq, %arg0, %c0_i32 : i32
    %1 = arith.extui %0 : i1 to i32
    %c0_i32_0 = arith.constant 0 : i32
    %2 = arith.cmpi ne, %1, %c0_i32_0 : i32
    scf.if %2 {
      %c0_i32_14 = arith.constant 0 : i32
      %c16_i32_15 = arith.constant 16 : i32
      %22 = arith.addi %c0_i32_14, %c16_i32_15 : i32
      %c1_i32_16 = arith.constant 1 : i32
      scf.for %arg6 = %c0_i32_14 to %22 step %c1_i32_16  : i32 {
        %c0_i32_18 = arith.constant 0 : i32
        %23 = arith.addi %c0_i32_18, %arg6 : i32
        %24 = arith.index_cast %23 : i32 to index
        %25 = memref.load %arg1[%24] : memref<16xi32, #tpu.memory_space<smem>>
        %c0_i32_19 = arith.constant 0 : i32
        %c0_i32_20 = arith.constant 0 : i32
        %c0_i32_21 = arith.constant 0 : i32
        %26 = tpu.memref_slice %arg2[%25, %c0_i32_21] : memref<65x128xf32, #tpu.memory_space<any>> -> memref<1x128xf32, #tpu.memory_space<any>>
        %27 = tpu.memref_squeeze %26 : memref<1x128xf32, #tpu.memory_space<any>> -> memref<128xf32, #tpu.memory_space<any>>
        %c0_i32_22 = arith.constant 0 : i32
        %28 = tpu.memref_slice %arg4[%c0_i32_19, %arg6, %c0_i32_22] : memref<2x16x128xf32, #tpu.memory_space<vmem>> -> memref<1x1x128xf32, #tpu.memory_space<vmem>>
        %29 = tpu.memref_squeeze %28 : memref<1x1x128xf32, #tpu.memory_space<vmem>> -> memref<128xf32, #tpu.memory_space<vmem>>
        %30 = tpu.memref_slice %arg5[%c0_i32_20] : memref<2x!tpu.dma_semaphore, #tpu.memory_space<semaphore_mem>> -> memref<1x!tpu.dma_semaphore, #tpu.memory_space<semaphore_mem>>
        %31 = tpu.memref_squeeze %30 : memref<1x!tpu.dma_semaphore, #tpu.memory_space<semaphore_mem>> -> memref<!tpu.dma_semaphore, #tpu.memory_space<semaphore_mem>>
        tpu.enqueue_dma source(%27 : memref<128xf32, #tpu.memory_space<any>>) target(%29 : memref<128xf32, #tpu.memory_space<vmem>>) target_semaphore(%31 : memref<!tpu.dma_semaphore, #tpu.memory_space<semaphore_mem>>)
      }
      %c16_i32_17 = arith.constant 16 : i32
    } else {
    }
    %c1_i32 = arith.constant 1 : i32
    %3 = arith.addi %arg0, %c1_i32 : i32
    %c1_i32_1 = arith.constant 1 : i32
    %4 = arith.cmpi slt, %3, %c1_i32_1 : i32
    %5 = arith.extui %4 : i1 to i32
    %c0_i32_2 = arith.constant 0 : i32
    %6 = arith.cmpi ne, %5, %c0_i32_2 : i32
    scf.if %6 {
      %c1_i32_14 = arith.constant 1 : i32
      %22 = arith.addi %arg0, %c1_i32_14 : i32
      %c1_i32_15 = arith.constant 1 : i32
      %23 = arith.addi %arg0, %c1_i32_15 : i32
      %c2_i32_16 = arith.constant 2 : i32
      %c0_i32_17 = arith.constant 0 : i32
      %24 = arith.cmpi eq, %c2_i32_16, %c0_i32_17 : i32
      %c1_i32_18 = arith.constant 1 : i32
      %25 = arith.select %24, %c1_i32_18, %c2_i32_16 : i32
      %26 = arith.remsi %23, %25 : i32
      %c0_i32_19 = arith.constant 0 : i32
      %27 = arith.cmpi ne, %26, %c0_i32_19 : i32
      %c0_i32_20 = arith.constant 0 : i32
      %28 = arith.cmpi slt, %26, %c0_i32_20 : i32
      %c0_i32_21 = arith.constant 0 : i32
      %29 = arith.cmpi slt, %25, %c0_i32_21 : i32
      %30 = arith.xori %28, %29 : i1
      %31 = arith.andi %30, %27 : i1
      %32 = arith.addi %26, %25 : i32
      %33 = arith.select %31, %32, %26 : i32
      %c0_i32_22 = arith.constant 0 : i32
      %c16_i32_23 = arith.constant 16 : i32
      %34 = arith.addi %c0_i32_22, %c16_i32_23 : i32
      %c1_i32_24 = arith.constant 1 : i32
      scf.for %arg6 = %c0_i32_22 to %34 step %c1_i32_24  : i32 {
        %c16_i32_26 = arith.constant 16 : i32
        %35 = arith.muli %22, %c16_i32_26 : i32
        %36 = arith.addi %35, %arg6 : i32
        %37 = arith.index_cast %36 : i32 to index
        %38 = memref.load %arg1[%37] : memref<16xi32, #tpu.memory_space<smem>>
        %c0_i32_27 = arith.constant 0 : i32
        %39 = tpu.memref_slice %arg2[%38, %c0_i32_27] : memref<65x128xf32, #tpu.memory_space<any>> -> memref<1x128xf32, #tpu.memory_space<any>>
        %40 = tpu.memref_squeeze %39 : memref<1x128xf32, #tpu.memory_space<any>> -> memref<128xf32, #tpu.memory_space<any>>
        %c0_i32_28 = arith.constant 0 : i32
        %41 = tpu.memref_slice %arg4[%33, %arg6, %c0_i32_28] : memref<2x16x128xf32, #tpu.memory_space<vmem>> -> memref<1x1x128xf32, #tpu.memory_space<vmem>>
        %42 = tpu.memref_squeeze %41 : memref<1x1x128xf32, #tpu.memory_space<vmem>> -> memref<128xf32, #tpu.memory_space<vmem>>
        %43 = tpu.memref_slice %arg5[%33] : memref<2x!tpu.dma_semaphore, #tpu.memory_space<semaphore_mem>> -> memref<1x!tpu.dma_semaphore, #tpu.memory_space<semaphore_mem>>
        %44 = tpu.memref_squeeze %43 : memref<1x!tpu.dma_semaphore, #tpu.memory_space<semaphore_mem>> -> memref<!tpu.dma_semaphore, #tpu.memory_space<semaphore_mem>>
        tpu.enqueue_dma source(%40 : memref<128xf32, #tpu.memory_space<any>>) target(%42 : memref<128xf32, #tpu.memory_space<vmem>>) target_semaphore(%44 : memref<!tpu.dma_semaphore, #tpu.memory_space<semaphore_mem>>)
      }
      %c16_i32_25 = arith.constant 16 : i32
    } else {
    }
    %c2_i32 = arith.constant 2 : i32
    %c0_i32_3 = arith.constant 0 : i32
    %7 = arith.cmpi eq, %c2_i32, %c0_i32_3 : i32
    %c1_i32_4 = arith.constant 1 : i32
    %8 = arith.select %7, %c1_i32_4, %c2_i32 : i32
    %9 = arith.remsi %arg0, %8 : i32
    %c0_i32_5 = arith.constant 0 : i32
    %10 = arith.cmpi ne, %9, %c0_i32_5 : i32
    %c0_i32_6 = arith.constant 0 : i32
    %11 = arith.cmpi slt, %9, %c0_i32_6 : i32
    %c0_i32_7 = arith.constant 0 : i32
    %12 = arith.cmpi slt, %8, %c0_i32_7 : i32
    %13 = arith.xori %11, %12 : i1
    %14 = arith.andi %13, %10 : i1
    %15 = arith.addi %9, %8 : i32
    %16 = arith.select %14, %15, %9 : i32
    %c0_i32_8 = arith.constant 0 : i32
    %c16_i32 = arith.constant 16 : i32
    %17 = arith.addi %c0_i32_8, %c16_i32 : i32
    %c1_i32_9 = arith.constant 1 : i32
    scf.for %arg6 = %c0_i32_8 to %17 step %c1_i32_9  : i32 {
      %c16_i32_14 = arith.constant 16 : i32
      %22 = arith.muli %arg0, %c16_i32_14 : i32
      %23 = arith.addi %22, %arg6 : i32
      %24 = arith.index_cast %23 : i32 to index
      %25 = memref.load %arg1[%24] : memref<16xi32, #tpu.memory_space<smem>>
      %c0_i32_15 = arith.constant 0 : i32
      %26 = tpu.memref_slice %arg2[%25, %c0_i32_15] : memref<65x128xf32, #tpu.memory_space<any>> -> memref<1x128xf32, #tpu.memory_space<any>>
      %27 = tpu.memref_squeeze %26 : memref<1x128xf32, #tpu.memory_space<any>> -> memref<128xf32, #tpu.memory_space<any>>
      %c0_i32_16 = arith.constant 0 : i32
      %28 = tpu.memref_slice %arg4[%16, %arg6, %c0_i32_16] : memref<2x16x128xf32, #tpu.memory_space<vmem>> -> memref<1x1x128xf32, #tpu.memory_space<vmem>>
      %29 = tpu.memref_squeeze %28 : memref<1x1x128xf32, #tpu.memory_space<vmem>> -> memref<128xf32, #tpu.memory_space<vmem>>
      %30 = tpu.memref_slice %arg5[%16] : memref<2x!tpu.dma_semaphore, #tpu.memory_space<semaphore_mem>> -> memref<1x!tpu.dma_semaphore, #tpu.memory_space<semaphore_mem>>
      %31 = tpu.memref_squeeze %30 : memref<1x!tpu.dma_semaphore, #tpu.memory_space<semaphore_mem>> -> memref<!tpu.dma_semaphore, #tpu.memory_space<semaphore_mem>>
      tpu.wait_dma2 semaphore(%31 : memref<!tpu.dma_semaphore, #tpu.memory_space<semaphore_mem>>) src(%27 : memref<128xf32, #tpu.memory_space<any>>) dst(%29 : memref<128xf32, #tpu.memory_space<vmem>>)
    }
    %c16_i32_10 = arith.constant 16 : i32
    %18 = arith.index_cast %16 : i32 to index
    %c0 = arith.constant 0 : index
    %c0_11 = arith.constant 0 : index
    %19 = vector.load %arg4[%18, %c0, %c0_11] : memref<2x16x128xf32, #tpu.memory_space<vmem>>, vector<1x16x128xf32>
    %20 = vector.shape_cast %19 : vector<1x16x128xf32> to vector<16x128xf32>
    %c0_12 = arith.constant 0 : index
    %c0_13 = arith.constant 0 : index
    %21 = vector.load %arg3[%c0_12, %c0_13] : memref<16x128xf32, #tpu.memory_space<vmem>>, vector<16x128xf32>
    tpu.vector_store %arg3[%c0_12, %c0_13], %20 {strides = array<i32>} : memref<16x128xf32, #tpu.memory_space<vmem>>, vector<16x128xf32>,
    return
  }
  func.func @transform_1(%arg0: i32, %arg1: memref<16xi32, #tpu.memory_space<smem>>) -> (i32, i32) {
    %c0_i32 = arith.constant 0 : i32
    %c0_i32_0 = arith.constant 0 : i32
    return %arg0, %c0_i32 : i32, i32
  }
}

</mosaic_0001>

<bundles_post_ra>
// kernel: tpu_custom_call.1
= control target key start
LH: loop header
LB: loop body
LE: loop exit
PB: predicated region body
PF: predicated region fallthrough
CT: control target
= control target key end

     0   :  { %s261_s9 = smov [#allocation5]   ;;  %s306_s0 = inlined_call_operand.hbm [shape: s32[16], index: 0, kind: input, shape index: {}]   ;;  %s307_s1 = inlined_call_operand.hbm [shape: f32[65,128], index: 1, kind: input, shape index: {}]   ;;  %s308_s2 = inlined_call_operand.hbm [shape: f32[16,128], index: 2, kind: output, shape index: {}]  }
   0x1   :  { %8 = dma.hbm_to_smem %s306_s0, 16, %s261_s9, [#allocation4] }
   0x2   :  { %247 = dma.done.wait [#allocation4], 16 }
   0x3   :  { %248 = vsyncadd [#allocation4], 4294967280 }
   0x4   :  { %10 = sfence }
   0x5   :  { %11 = vsyncpa [#allocation7], 0  ;;  %s284_s12 = smov 0  }
   0x6 LB: > { %s22_s13 = sld [smem:[#allocation5 + %s255_s12]]  ;;  %s25_s14 = scalar_lea.vmem [#allocation2], %s255_s12  ;;  %s255_s12 = sphi %s284_s12, %s21_s12  }
   0x7   : > { %s33_s15 = sshll.u32 %s25_s14, 4  ;;  %s199_s22 = scalar_lea.hbm %s307_s1, 1152  ;;  %s34_s15 = int_to_ptr.vmem [resolvable:$true] %s33_s15 }
   0xc   : > { %s162_s16 = sshll.u32 %s22_s13, 4 }
   0xd   : > { %s24_s18 = scalar_lea.hbm %s307_s1, %s162_s16 }
   0xe   : > { %s197_s19 = scalar_lea.hbm %s24_s18, 16  ;;  %p200_p1 = scmp.lt.s32.totalorder %s24_s18, %s307_s1 }
   0xf   : > { %p198_p0 = scmp.ne.s32.totalorder %s24_s18, %s197_s19  ;;  %p201_p2 = scmp.lt.s32.totalorder %s199_s22, %s197_s19 }
  0x11   : > { %p202_p3 = por %p201_p2, %p200_p1 }
  0x13   : > { %p203_p4 = pnand %p202_p3, %p198_p0 }
  0x15   : > { %206 = shalt.err (!%p203_p4)  }
  0x16   : > { %s207_s25 = scalar_lea.vmem %s34_s15, 16  ;;  %s262_s26 = smov [#allocation2]  }
  0x17   : > { %p208_p5 = scmp.ne.s32.totalorder %s34_s15, %s207_s25  ;;  %s209_s27 = sshll.u32 %s262_s26, 4  ;;  %s210_s27 = int_to_ptr.vmem [resolvable:$false] %s209_s27 }
  0x18   : > { %s211_s28 = scalar_lea.vmem %s210_s27, 512  ;;  %p212_p6 = scmp.lt.s32.totalorder %s34_s15, %s210_s27 }
  0x19   : > { %p213_p7 = scmp.lt.s32.totalorder %s211_s28, %s207_s25 }
  0x1b   : > { %p214_p8 = por %p213_p7, %p212_p6 }
  0x1d   : > { %p215_p9 = pnand %p214_p8, %p208_p5 }
  0x1f   : > { %218 = shalt.err (!%p215_p9)  }
  0x20   : > { %36 = dma.hbm_to_vmem [thread:$0]  %s24_s18, 16, %s34_s15, [#allocation3] }
  0x21   : > { %s21_s12 = sadd.s32 1, %s255_s12  }
  0x22   : > { %p18_p10 = scmp.ge.s32.totalorder %s21_s12, 16  }
  0x23   :  { %s257_s29 = smov (%p18_p10), 0  }
  0x24   :  { %20 = sbr.rel (!%p18_p10) target bundleno = 6 (0x6), region = 65 }
  0x29 LB: > { %249 = dma.done.wait [#allocation3], 16  ;;  %s259_s29 = sphi %s257_s29, %s93_s29  }
  0x2a   : > { %250 = vsyncadd [#allocation3], 4294967280  ;;  %s93_s29 = sadd.s32 1, %s259_s29  }
  0x2b   : > { %p90_p11 = scmp.ge.s32.totalorder %s93_s29, 16  }
  0x2c   :  { %v102_v0 = vld [vmem:[#allocation2] sm:$0xff] (%p90_p11)  ;;  %v103_v1 = vld [vmem:[#allocation2 + $0x8] sm:$0xff] (%p90_p11)  ;;  %s263_s30 = smov (%p90_p11), [#allocation6]  }
  0x2d   :  { %92 = sbr.rel (!%p90_p11) target bundleno = 41 (0x29), region = 87  ;;  %104 = vst [vmem:[#allocation6] sm:$0xff] (%p90_p11), %v102_v0  ;;  %105 = vst [vmem:[#allocation6 + $0x8] sm:$0xff] (%p90_p11), %v103_v1  ;;  %s111_s3 = sshll.u32 (%p90_p11), %s263_s30, 4  ;;  %s112_s3 = int_to_ptr.vmem [resolvable:$true] %s111_s3 }
  0x2e   :  { %s219_s4 = scalar_lea.vmem (%p90_p11), %s112_s3, 256  ;;  %p224_p13 = scmp.lt.s32.totalorder (%p90_p11), %s112_s3, %s112_s3 }
  0x2f   :  { %p220_p12 = scmp.ne.s32.totalorder (%p90_p11), %s112_s3, %s219_s4  ;;  %p225_p0 = scmp.lt.s32.totalorder (%p90_p11), %s219_s4, %s219_s4 }
  0x31   :  { %p226_p1 = por (%p90_p11), %p225_p0, %p224_p13 }
  0x33   :  { %p227_p2 = pnand %p226_p1, %p220_p12 }
  0x35   :  { %230 = shalt.err (!%p227_p2)
}
  0x36   :  { %s264_s1 = smov 128   ;;  %s265_s5 = smov 8  }
  0x37   :  { %117 = dma.vmem_to_hbm [thread:$0]  %s112_s3, 256, %s308_s2, [#allocation7], %s264_s1, %s264_s1, %s265_s5  }
  0x38   :  { %251 = dma.done.wait [#allocation7], 256  }
  0x39   :  { %252 = vsyncadd [#allocation7], 4294967040 }
  0x3a   :  { %121 = vsyncpa [#allocation7], 1 }
  0x3b   :  { %122 = vsyncmov [#allocation3] }
  0x3e   :  { %s123_s8 = vpop.sfrf %122 }
  0x3f   :  { %p165_p3 = scmp.ne.s32.totalorder %s123_s8, 0 }
  0x41   :  { %127 = shalt.err (%p165_p3)  }
  0x42   :  { %129 = vsyncmov [#allocation3 + $0x1] }
  0x45   :  { %s130_s9 = vpop.sfrf %129 }
  0x46   :  { %p166_p4 = scmp.ne.s32.totalorder %s130_s9, 0 }
  0x48   :  { %134 = shalt.err (%p166_p4)  }

</bundles_post_ra>
